<compile_context>
chip_gen: v7x
topology: tpu7x:2x2x1
jax: 0.10.0
libtpu: 0.0.40
codegen_flags: <defaults>
</compile_context>

<pallas_src>
import functools
import math

import jax
import jax.numpy as jnp
from jax.experimental import pallas as pl
from jax.experimental.pallas import tpu as pltpu


def _round_up(x, m):
    return ((x + m - 1) // m) * m


def event_encoder_kernel(
    t_ref,                       # (1, T)  timestamps (io_dtype)
    s_ref,                       # (2, T)  x/y locations (io_dtype)
    w_tm_ref, b_tm_ref,          # temporal Linear(1 -> H):        (H, 1), (H, 1)
    w_sp_ref, b_sp_ref,          # spatial  Linear(2 -> H):        (H, 2), (H, 1)
    w1t_ref, w1s_ref, b1_ref,    # encoder  Linear(2H -> H) split: (H, H), (H, H), (H, 1)
    w2_ref, b2_ref,              # encoder  Linear(H -> head_dim): (D, H), (D, 1)
    out_ref,                     # (D, T)  (io_dtype)
):
    t = t_ref[...].astype(jnp.float32)                 # (1, T)
    s = s_ref[...].astype(jnp.float32)                 # (2, T)

    # K=1 / K=2 layers on the VPU: broadcast FMAs (no MXU push/pop for tiny K).
    emb_time = jnp.maximum(w_tm_ref[...] * t + b_tm_ref[...], 0.0)            # (H, T)
    w_sp = w_sp_ref[...]
    emb_state = jnp.maximum(
        w_sp[:, 0:1] * s[0:1, :] + w_sp[:, 1:2] * s[1:2, :] + b_sp_ref[...],
        0.0,
    )                                                                          # (H, T)

    # torch.cat([emb_time, emb_state], -1) @ W1.T folded into two K=H MXU dots:
    # no (2H, T) intermediate is ever stored to VMEM.
    h = jnp.maximum(
        jnp.dot(w1t_ref[...], emb_time, preferred_element_type=jnp.float32)
        + jnp.dot(w1s_ref[...], emb_state, preferred_element_type=jnp.float32)
        + b1_ref[...],
        0.0,
    )                                                                          # (H, T)

    # Final projection Linear(H -> head_dim); lane-dense store.
    out_ref[...] = (
        jnp.dot(w2_ref[...], h, preferred_element_type=jnp.float32) + b2_ref[...]
    ).astype(out_ref.dtype)                                                    # (D, T)


@functools.partial(
    jax.jit, static_argnames=("tile_n", "io_dtype", "feature_major_output")
)
def event_encoder(state, time, params, *, tile_n=8192, io_dtype=jnp.float32,
                  feature_major_output=False):
    """state: (N, 2) f32, time: (N, 1) f32 -> (N, head_dim) (or (head_dim, N))."""
    n = state.shape[0]
    hidden = params["w_sp"].shape[0]
    head_dim = params["w2"].shape[0]
    assert hidden % 8 == 0, "hidden_dim must be a multiple of 8 (sublane tiling)"

    # ---- lane tiling over N --------------------------------------------------
    lane_n = _round_up(n, 128)
    tile = max(128, min((tile_n // 128) * 128, lane_n))
    # Ensure >= 2 grid steps when possible so ("parallel",) shards across both
    # TensorCores on v7x instead of leaving one idle.
    if tile >= lane_n and lane_n >= 256:
        tile = _round_up(lane_n // 2, 128)
    n_pad = _round_up(lane_n, tile)
    grid = (n_pad // tile,)

    # ---- feature-major, lane-dense inputs (no zeros slab / scatter) ---------
    pad = n_pad - n
    t_row = jnp.pad(time.astype(io_dtype).T, ((0, 0), (0, pad)))      # (1, n_pad)
    s_rows = jnp.pad(state.astype(io_dtype).T, ((0, 0), (0, pad)))    # (2, n_pad)

    # ---- params: PyTorch-native (out, in) weights; split w1 for the cat fold
    w1 = params["w1"]
    w1t = w1[:, :hidden]          # multiplies emb_time (cat order: time first)
    w1s = w1[:, hidden:]          # multiplies emb_state

    def weight_spec(shape):
        # Full block, constant index -> stays VMEM-resident across the grid.
        return pl.BlockSpec(shape, lambda i: (0, 0))

    # ---- cost & VMEM budget --------------------------------------------------
    itemsize = jnp.dtype(io_dtype).itemsize
    flops_per_col = (2 * hidden            # temporal FMA
                     + 4 * hidden          # spatial FMAs
                     + 4 * hidden * hidden # two K=H encoder dots
                     + 2 * hidden * head_dim)
    weight_bytes = sum(int(v.size) * 4 for v in params.values())
    cost = pl.CostEstimate(
        flops=flops_per_col * n_pad,
        transcendentals=0,
        bytes_accessed=n_pad * (3 + head_dim) * itemsize + weight_bytes,
    )
    # Generous per-tile footprint estimate: double-buffered streams (inputs
    # sublane-padded to 8) + f32 intermediates (emb_time, emb_state, h, slack).
    stream_bytes = (8 + 8 + _round_up(head_dim, 8)) * tile * itemsize * 2
    interm_bytes = 4 * hidden * tile * 4
    vmem_limit = int(min(64 << 20,
                         max(32 << 20,
                             2 * (stream_bytes + interm_bytes)
                             + weight_bytes + (2 << 20))))

    out_t = pl.pallas_call(
        event_encoder_kernel,
        out_shape=jax.ShapeDtypeStruct((head_dim, n_pad), io_dtype),
        grid=grid,
        in_specs=[
            pl.BlockSpec((1, tile), lambda i: (0, i)),   # streamed time
            pl.BlockSpec((2, tile), lambda i: (0, i)),   # streamed state
            weight_spec((hidden, 1)), weight_spec((hidden, 1)),        # w_tm, b_tm
            weight_spec((hidden, 2)), weight_spec((hidden, 1)),        # w_sp, b_sp
            weight_spec((hidden, hidden)), weight_spec((hidden, hidden)),
            weight_spec((hidden, 1)),                                  # w1t, w1s, b1
            weight_spec((head_dim, hidden)), weight_spec((head_dim, 1)),  # w2, b2
        ],
        out_specs=pl.BlockSpec((head_dim, tile), lambda i: (0, i)),
        compiler_params=pltpu.CompilerParams(
            dimension_semantics=("parallel",),           # v7x: shard tiles over 2 TCs
            vmem_limit_bytes=vmem_limit,
        ),
        cost_estimate=cost,
    )(
        t_row, s_rows,
        params["w_tm"], params["b_tm"],
        params["w_sp"], params["b_sp"],
        w1t, w1s, params["b1"],
        params["w2"], params["b2"],
    )

    if feature_major_output:
        # (head_dim, N): hand this directly to feature-major consumers (e.g.
        # the contrastive-loss matmul) to avoid a full extra HBM transpose pass.
        return out_t[:, :n]
    # PyTorch (N, head_dim) orientation; drop padded columns.
    return out_t[:, :n].T


def init_params(key, hidden_dim, head_dim):
    """PyTorch-style init; weights in native (out, in) layout, biases (out, 1)."""
    ks = jax.random.split(key, 8)

    def linear(kw, kb, fan_in, fan_out):
        bound = 1.0 / math.sqrt(fan_in)
        w = jax.random.uniform(kw, (fan_out, fan_in), jnp.float32, -bound, bound)
        b = jax.random.uniform(kb, (fan_out, 1), jnp.float32, -bound, bound)
        return w, b

    w_sp, b_sp = linear(ks[0], ks[1], 2, hidden_dim)              # spatial
    w_tm, b_tm = linear(ks[2], ks[3], 1, hidden_dim)              # temporal
    w1, b1 = linear(ks[4], ks[5], 2 * hidden_dim, hidden_dim)     # encoder[0]
    w2, b2 = linear(ks[6], ks[7], hidden_dim, head_dim)           # encoder[2]
    return {"w_sp": w_sp, "b_sp": b_sp, "w_tm": w_tm, "b_tm": b_tm,
            "w1": w1, "b1": b1, "w2": w2, "b2": b2}


def event_encoder_ref(state, time, params):
    """Pure-JAX reference matching the PyTorch forward exactly."""
    emb_state = jnp.maximum(state @ params["w_sp"].T + params["b_sp"].T, 0.0)
    emb_time = jnp.maximum(time @ params["w_tm"].T + params["b_tm"].T, 0.0)
    cat = jnp.concatenate([emb_time, emb_state], axis=-1)
    h = jnp.maximum(cat @ params["w1"].T + params["b1"].T, 0.0)
    return h @ params["w2"].T + params["b2"].T


if __name__ == "__main__":
    hidden_dim, head_dim = 32, 16
    n = 300  # not a multiple of 128 -> exercises padding + a 2-step grid

    key = jax.random.PRNGKey(0)
    k_state, k_time, k_params = jax.random.split(key, 3)

    state = jax.random.normal(k_state, (n, 2), jnp.float32)   # (x, y) locations
    time = jax.random.normal(k_time, (n, 1), jnp.float32)     # timestamps
    params = init_params(k_params, hidden_dim, head_dim)

    ref = event_encoder_ref(state, time, params)

    # f32 path, PyTorch (N, head_dim) orientation.
    out = event_encoder(state, time, params)
    jax.block_until_ready(out)
    assert out.shape == (n, head_dim)
    assert jnp.allclose(out, ref, atol=1e-4, rtol=1e-4), \
        float(jnp.max(jnp.abs(out - ref)))

    # Feature-major output: skips the post-kernel transpose pass.
    out_fm = event_encoder(state, time, params, feature_major_output=True)
    jax.block_until_ready(out_fm)
    assert out_fm.shape == (head_dim, n)
    assert jnp.allclose(out_fm.T, ref, atol=1e-4, rtol=1e-4)

    # bf16 streaming path (halves HBM traffic on v6e/v7x); f32 accumulation
    # inside the kernel, so only the io quantization loosens the tolerance.
    out_bf = event_encoder(state, time, params, io_dtype=jnp.bfloat16)
    jax.block_until_ready(out_bf)
    assert jnp.allclose(out_bf.astype(jnp.float32), ref, atol=5e-2, rtol=5e-2)

    print("KERNEL_OK")
</pallas_src>

<mosaic_0001>
module attributes {stable_mosaic.version = 11 : i64} {
  func.func @event_encoder_kernel(%arg0: i32, %arg1: memref<1x256xf32, #tpu.memory_space<vmem>>, %arg2: memref<2x256xf32, #tpu.memory_space<vmem>>, %arg3: memref<32x1xf32, #tpu.memory_space<vmem>>, %arg4: memref<32x1xf32, #tpu.memory_space<vmem>>, %arg5: memref<32x2xf32, #tpu.memory_space<vmem>>, %arg6: memref<32x1xf32, #tpu.memory_space<vmem>>, %arg7: memref<32x32xf32, #tpu.memory_space<vmem>>, %arg8: memref<32x32xf32, #tpu.memory_space<vmem>>, %arg9: memref<32x1xf32, #tpu.memory_space<vmem>>, %arg10: memref<16x32xf32, #tpu.memory_space<vmem>>, %arg11: memref<16x1xf32, #tpu.memory_space<vmem>>, %arg12: memref<16x256xf32, #tpu.memory_space<vmem>>) attributes {dimension_semantics = [#tpu.dimension_semantics<parallel>], iteration_bounds = array<i64: 2>, scalar_prefetch = 0 : i64, scratch_operands = 0 : i64, tpu.core_type = #tpu.core_type<tc>, window_params = [{transform_indices = @transform_0, window_bounds = array<i64: 1, 256>}, {transform_indices = @transform_1, window_bounds = array<i64: 2, 256>}, {pipeline_mode = #tpu.pipeline_mode<synchronous>, transform_indices = @transform_2, window_bounds = array<i64: 32, 1>}, {pipeline_mode = #tpu.pipeline_mode<synchronous>, transform_indices = @transform_3, window_bounds = array<i64: 32, 1>}, {pipeline_mode = #tpu.pipeline_mode<synchronous>, transform_indices = @transform_4, window_bounds = array<i64: 32, 2>}, {pipeline_mode = #tpu.pipeline_mode<synchronous>, transform_indices = @transform_5, window_bounds = array<i64: 32, 1>}, {pipeline_mode = #tpu.pipeline_mode<synchronous>, transform_indices = @transform_6, window_bounds = array<i64: 32, 32>}, {pipeline_mode = #tpu.pipeline_mode<synchronous>, transform_indices = @transform_7, window_bounds = array<i64: 32, 32>}, {pipeline_mode = #tpu.pipeline_mode<synchronous>, transform_indices = @transform_8, window_bounds = array<i64: 32, 1>}, {pipeline_mode = #tpu.pipeline_mode<synchronous>, transform_indices = @transform_9, window_bounds = array<i64: 16, 32>}, {pipeline_mode = #tpu.pipeline_mode<synchronous>, transform_indices = @transform_10, window_bounds = array<i64: 16, 1>}, {transform_indices = @transform_11, window_bounds = array<i64: 16, 256>}]} {
    %c0 = arith.constant 0 : index
    %c0_0 = arith.constant 0 : index
    %0 = vector.load %arg1[%c0, %c0_0] : memref<1x256xf32, #tpu.memory_space<vmem>>, vector<1x256xf32>
    %c0_1 = arith.constant 0 : index
    %c0_2 = arith.constant 0 : index
    %1 = vector.load %arg2[%c0_1, %c0_2] : memref<2x256xf32, #tpu.memory_space<vmem>>, vector<2x256xf32>
    %c0_3 = arith.constant 0 : index
    %c0_4 = arith.constant 0 : index
    %2 = vector.load %arg3[%c0_3, %c0_4] : memref<32x1xf32, #tpu.memory_space<vmem>>, vector<32x1xf32>
    %3 = vector.broadcast %2 : vector<32x1xf32> to vector<32x256xf32>
    %4 = vector.broadcast %0 : vector<1x256xf32> to vector<32x256xf32>
    %5 = arith.mulf %3, %4 : vector<32x256xf32>
    %c0_5 = arith.constant 0 : index
    %c0_6 = arith.constant 0 : index
    %6 = vector.load %arg4[%c0_5, %c0_6] : memref<32x1xf32, #tpu.memory_space<vmem>>, vector<32x1xf32>
    %7 = vector.broadcast %6 : vector<32x1xf32> to vector<32x256xf32>
    %8 = arith.addf %5, %7 : vector<32x256xf32>
    %cst = arith.constant 0.000000e+00 : f32
    %9 = vector.broadcast %cst : f32 to vector<32x256xf32>
    %10 = arith.maximumf %8, %9 : vector<32x256xf32>
    %c0_7 = arith.constant 0 : index
    %c0_8 = arith.constant 0 : index
    %11 = vector.load %arg5[%c0_7, %c0_8] : memref<32x2xf32, #tpu.memory_space<vmem>>, vector<32x2xf32>
    %12 = vector.extract_strided_slice %11 {offsets = [0, 0], sizes = [32, 1], strides = [1, 1]} : vector<32x2xf32> to vector<32x1xf32>
    %13 = vector.extract_strided_slice %1 {offsets = [0, 0], sizes = [1, 256], strides = [1, 1]} : vector<2x256xf32> to vector<1x256xf32>
    %14 = vector.broadcast %12 : vector<32x1xf32> to vector<32x256xf32>
    %15 = vector.broadcast %13 : vector<1x256xf32> to vector<32x256xf32>
    %16 = arith.mulf %14, %15 : vector<32x256xf32>
    %17 = vector.extract_strided_slice %11 {offsets = [0, 1], sizes = [32, 1], strides = [1, 1]} : vector<32x2xf32> to vector<32x1xf32>
    %18 = vector.extract_strided_slice %1 {offsets = [1, 0], sizes = [1, 256], strides = [1, 1]} : vector<2x256xf32> to vector<1x256xf32>
    %19 = vector.broadcast %17 : vector<32x1xf32> to vector<32x256xf32>
    %20 = vector.broadcast %18 : vector<1x256xf32> to vector<32x256xf32>
    %21 = arith.mulf %19, %20 : vector<32x256xf32>
    %22 = arith.addf %16, %21 : vector<32x256xf32>
    %c0_9 = arith.constant 0 : index
    %c0_10 = arith.constant 0 : index
    %23 = vector.load %arg6[%c0_9, %c0_10] : memref<32x1xf32, #tpu.memory_space<vmem>>, vector<32x1xf32>
    %24 = vector.broadcast %23 : vector<32x1xf32> to vector<32x256xf32>
    %25 = arith.addf %22, %24 : vector<32x256xf32>
    %cst_11 = arith.constant 0.000000e+00 : f32
    %26 = vector.broadcast %cst_11 : f32 to vector<32x256xf32>
    %27 = arith.maximumf %25, %26 : vector<32x256xf32>
    %c0_12 = arith.constant 0 : index
    %c0_13 = arith.constant 0 : index
    %28 = vector.load %arg7[%c0_12, %c0_13] : memref<32x32xf32, #tpu.memory_space<vmem>>, vector<32x32xf32>
    %cst_14 = arith.constant dense<0.000000e+00> : vector<32x256xf32>
    %29 = tpu.matmul %28, %10, %cst_14 {dimension_numbers = #tpu.dot_dimension_numbers<[1], [0], [0], [1], [0, 0, 1, 1], [], []>} : vector<32x32xf32>, vector<32x256xf32>, vector<32x256xf32> -> vector<32x256xf32>
    %c0_15 = arith.constant 0 : index
    %c0_16 = arith.constant 0 : index
    %30 = vector.load %arg8[%c0_15, %c0_16] : memref<32x32xf32, #tpu.memory_space<vmem>>, vector<32x32xf32>
    %cst_17 = arith.constant dense<0.000000e+00> : vector<32x256xf32>
    %31 = tpu.matmul %30, %27, %cst_17 {dimension_numbers = #tpu.dot_dimension_numbers<[1], [0], [0], [1], [0, 0, 1, 1], [], []>} : vector<32x32xf32>, vector<32x256xf32>, vector<32x256xf32> -> vector<32x256xf32>
    %32 = arith.addf %29, %31 : vector<32x256xf32>
    %c0_18 = arith.constant 0 : index
    %c0_19 = arith.constant 0 : index
    %33 = vector.load %arg9[%c0_18, %c0_19] : memref<32x1xf32, #tpu.memory_space<vmem>>, vector<32x1xf32>
    %34 = vector.broadcast %33 : vector<32x1xf32> to vector<32x256xf32>
    %35 = arith.addf %32, %34 : vector<32x256xf32>
    %cst_20 = arith.constant 0.000000e+00 : f32
    %36 = vector.broadcast %cst_20 : f32 to vector<32x256xf32>
    %37 = arith.maximumf %35, %36 : vector<32x256xf32>
    %c0_21 = arith.constant 0 : index
    %c0_22 = arith.constant 0 : index
    %38 = vector.load %arg10[%c0_21, %c0_22] : memref<16x32xf32, #tpu.memory_space<vmem>>, vector<16x32xf32>
    %cst_23 = arith.constant dense<0.000000e+00> : vector<16x256xf32>
    %39 = tpu.matmul %38, %37, %cst_23 {dimension_numbers = #tpu.dot_dimension_numbers<[1], [0], [0], [1], [0, 0, 1, 1], [], []>} : vector<16x32xf32>, vector<32x256xf32>, vector<16x256xf32> -> vector<16x256xf32>
    %c0_24 = arith.constant 0 : index
    %c0_25 = arith.constant 0 : index
    %40 = vector.load %arg11[%c0_24, %c0_25] : memref<16x1xf32, #tpu.memory_space<vmem>>, vector<16x1xf32>
    %41 = vector.broadcast %40 : vector<16x1xf32> to vector<16x256xf32>
    %42 = arith.addf %39, %41 : vector<16x256xf32>
    %c0_26 = arith.constant 0 : index
    %c0_27 = arith.constant 0 : index
    %43 = vector.load %arg12[%c0_26, %c0_27] : memref<16x256xf32, #tpu.memory_space<vmem>>, vector<16x256xf32>
    tpu.vector_store %arg12[%c0_26, %c0_27], %42 {strides = array<i32>} : memref<16x256xf32, #tpu.memory_space<vmem>>, vector<16x256xf32>,
    return
  }
  func.func @transform_0(%arg0: i32) -> (i32, i32) {
    %c0_i32 = arith.constant 0 : i32
    %c0_i32_0 = arith.constant 0 : i32
    return %c0_i32, %arg0 : i32, i32
  }
  func.func @transform_1(%arg0: i32) -> (i32, i32) {
    %c0_i32 = arith.constant 0 : i32
    %c0_i32_0 = arith.constant 0 : i32
    return %c0_i32, %arg0 : i32, i32
  }
  func.func @transform_2(%arg0: i32) -> (i32, i32) {
    %c0_i32 = arith.constant 0 : i32
    %c0_i32_0 = arith.constant 0 : i32
    %c0_i32_1 = arith.constant 0 : i32
    return %c0_i32, %c0_i32_0 : i32, i32
  }
  func.func @transform_3(%arg0: i32) -> (i32, i32) {
    %c0_i32 = arith.constant 0 : i32
    %c0_i32_0 = arith.constant 0 : i32
    %c0_i32_1 = arith.constant 0 : i32
    return %c0_i32, %c0_i32_0 : i32, i32
  }
  func.func @transform_4(%arg0: i32) -> (i32, i32) {
    %c0_i32 = arith.constant 0 : i32
    %c0_i32_0 = arith.constant 0 : i32
    %c0_i32_1 = arith.constant 0 : i32
    return %c0_i32, %c0_i32_0 : i32, i32
  }
  func.func @transform_5(%arg0: i32) -> (i32, i32) {
    %c0_i32 = arith.constant 0 : i32
    %c0_i32_0 = arith.constant 0 : i32
    %c0_i32_1 = arith.constant 0 : i32
    return %c0_i32, %c0_i32_0 : i32, i32
  }
  func.func @transform_6(%arg0: i32) -> (i32, i32) {
    %c0_i32 = arith.constant 0 : i32
    %c0_i32_0 = arith.constant 0 : i32
    %c0_i32_1 = arith.constant 0 : i32
    return %c0_i32, %c0_i32_0 : i32, i32
  }
  func.func @transform_7(%arg0: i32) -> (i32, i32) {
    %c0_i32 = arith.constant 0 : i32
    %c0_i32_0 = arith.constant 0 : i32
    %c0_i32_1 = arith.constant 0 : i32
    return %c0_i32, %c0_i32_0 : i32, i32
  }
  func.func @transform_8(%arg0: i32) -> (i32, i32) {
    %c0_i32 = arith.constant 0 : i32
    %c0_i32_0 = arith.constant 0 : i32
    %c0_i32_1 = arith.constant 0 : i32
    return %c0_i32, %c0_i32_0 : i32, i32
  }
  func.func @transform_9(%arg0: i32) -> (i32, i32) {
    %c0_i32 = arith.constant 0 : i32
    %c0_i32_0 = arith.constant 0 : i32
    %c0_i32_1 = arith.constant 0 : i32
    return %c0_i32, %c0_i32_0 : i32, i32
  }
  func.func @transform_10(%arg0: i32) -> (i32, i32) {
    %c0_i32 = arith.constant 0 : i32
    %c0_i32_0 = arith.constant 0 : i32
    %c0_i32_1 = arith.constant 0 : i32
    return %c0_i32, %c0_i32_0 : i32, i32
  }
  func.func @transform_11(%arg0: i32) -> (i32, i32) {
    %c0_i32 = arith.constant 0 : i32
    %c0_i32_0 = arith.constant 0 : i32
    return %c0_i32, %arg0 : i32, i32
  }
}

</mosaic_0001>

<bundles_post_ra>
// kernel: event_encoder.1
= control target key start
LH: loop header
LB: loop body
LE: loop exit
PB: predicated region body
PF: predicated region fallthrough
CT: control target
= control target key end

     0   :  { %s1254_s17 = smov 0   ;;  %s1256_s18 = smov 0   ;;  %s1439_s0 = inlined_call_operand.vmem [shape: f32[1,512], index: 0, kind: input, shape index: {}]   ;;  %s1440_s1 = inlined_call_operand.vmem [shape: f32[2,512], index: 1, kind: input, shape index: {}]   ;;  %s1441_s2 = inlined_call_operand.vmem [shape: f32[32,1], index: 2, kind: input, shape index: {}]   ;;  %s1442_s3 = inlined_call_operand.vmem [shape: f32[32,1], index: 3, kind: input, shape index: {}]   ;;  %s1443_s4 = inlined_call_operand.vmem [shape: f32[32,2], index: 4, kind: input, shape index: {}]   ;;  %s1444_s5 = inlined_call_operand.vmem [shape: f32[32,1], index: 5, kind: input, shape index: {}]   ;;  %s1445_s6 = inlined_call_operand.vmem [shape: f32[32,32], index: 6, kind: input, shape index: {}]   ;;  %s1446_s7 = inlined_call_operand.vmem [shape: f32[32,32], index: 7, kind: input, shape index: {}]   ;;  %s1447_s8 = inlined_call_operand.vmem [shape: f32[32,1], index: 8, kind: input, shape index: {}]   ;;  %s1448_s9 = inlined_call_operand.vmem [shape: f32[16,32], index: 9, kind: input, shape index: {}]   ;;  %s1449_s10 = inlined_call_operand.vmem [shape: f32[16,1], index: 10, kind: input, shape index: {}]   ;;  %s1450_s11 = inlined_call_operand.vmem [shape: f32[16,512], index: 11, kind: output, shape index: {}]  }
   0x1   :  { %s1258_s19 = smov 0  }
   0x2 LB: > { %s1267_s20 = sadd.s32 4294967295, %s1189_s19   ;;  %s1269_s21 = sadd.s32 1, %s1189_s19   ;;  %s1189_s19 = sphi %s1258_s19, %s1454_s19   ;;  %s1185_s18 = sphi %s1256_s18, %s1453_s18   ;;  %s1181_s17 = sphi %s1254_s17, %s1452_s17  }
   0x3   : > { %s266_s22 = ssub.s32 %s1189_s19, %s1269_s21  ;;  %s269_s23 = sadd.s32 1, %s1185_s18 }
   0x4   : > { %p267_p0 = scmp.eq.s32.totalorder %s266_s22, 0  ;;  %p279_p1 = scmp.ne.s32.totalorder %s1185_s18, %s1181_s17 }
   0x5   : > { %p280_p2 = scmp.eq.s32.totalorder %s1267_s20, 1  ;;  %p1077_p3 = scmp.ge.s32.totalorder %s1189_s19, 1 }
   0x6   : > { %s1277_s24 = scalar_select %p267_p0, %s1185_s18, %s269_s23  }
   0x7   : > { %p1279_p4 = por %p280_p2, %p279_p1  ;;  %p348_p5 = scmp.lt.s32.totalorder %s1189_s19, 3 }
   0x9   : > { %p349_p6 = pnand %p1077_p3, %p348_p5 }
   0xa   : > { %v490_v0 = vld [vmem:[%s1443_s4 + $0x10] sm:$0xff] (!%p349_p6)  ;;  %v488_v1 = vld [vmem:[%s1443_s4] sm:$0xff] (!%p349_p6)  ;;  %v1191_v2 = vmov (!%p349_p6), 1   ;;  %v489_v3 = vld [vmem:[%s1443_s4 + $0x8] sm:$0xff] (!%p349_p6)  ;;  %v1192_v4 = vmov (!%p349_p6), 0   ;;  %v1193_v18 = vmov (!%p349_p6), 0.0   ;;  %v430_v25 = vlaneseq (!%p349_p6) }
   0xb   : > { %352 = sbr.rel (%p349_p6) target bundleno = 655 (0x28f), region = 64  ;;  %1163 = vset.pattern.permute.xlu0 (!%p349_p6), %v1191_v2  ;;  %1161 = vset.pattern.permute.xlu1 (!%p349_p6), %v1191_v2  ;;  %v491_v5 = vld [vmem:[%s1443_s4 + $0x18] sm:$0xff] (!%p349_p6)  ;;  %v590_v6 = vld [vmem:[%s1444_s5 + $0x8] sm:$0xff] (!%p349_p6)  ;;  %v589_v7 = vld [vmem:[%s1444_s5] sm:$0xff] (!%p349_p6)  ;;  %s1079_s12 = sshll.u32 (!%p349_p6), %s1267_s20, 1  ;;  %vm637_vm0 = vcmask (!%p349_p6), 261120  }
   0xc   : > { %548 = vperm.xlu0 (!%p349_p6), %1163, %v490_v0   ;;  %540 = vperm.xlu1 (!%p349_p6), %1161, %v488_v1   ;;  %v405_v8 = vld [vmem:[%s1441_s2] sm:$0xff] (!%p349_p6)  ;;  %v591_v9 = vld [vmem:[%s1444_s5 + $0x10] sm:$0xff] (!%p349_p6)  ;;  %v592_v11 = vld [vmem:[%s1444_s5 + $0x18] sm:$0xff] (!%p349_p6)  ;;  %p392_p7 = scmp.lt.s32.totalorder (!%p349_p6), %s1079_s12, 3  ;;  %v431_v27 = vshrl.u32 (!%p349_p6), %v430_v25, 7  ;;  %s388_s14 = sand.u32 (!%p349_p6), 1, %s1181_s17  }
   0xd   : > { %v448_v10 = vld [vmem:[%s1442_s3] sm:$0xff] (!%p349_p6)  ;;  %v407_v12 = vld [vmem:[%s1441_s2 + $0x10] sm:$0xff] (!%p349_p6)  ;;  %v406_v13 = vld [vmem:[%s1441_s2 + $0x8] sm:$0xff] (!%p349_p6)  ;;  %714 = vmatprep.mubr.f32.mxu0 (!%p349_p6), %v1193_v18  ;;  %821 = vmatprep.mubr.f32.mxu1 (!%p349_p6), %v1193_v18  ;;  %s1078_s15 = sshll.u32 (!%p349_p6), %s388_s14, 5 }
   0xe   : > { %v450_v14 = vld [vmem:[%s1442_s3 + $0x10] sm:$0xff] (!%p349_p6)  ;;  %v449_v15 = vld [vmem:[%s1442_s3 + $0x8] sm:$0xff] (!%p349_p6)  ;;  %v840_v16 = vld [vmem:[%s1447_s8] sm:$0xff] (!%p349_p6)  ;;  %v1358_v29 = vsub.s32 (!%p349_p6), 0, %v431_v27  ;;  %v519_v30 = vsub.s32 (!%p349_p6), 2, %v431_v27  ;;  %v1360_v31 = vsub.s32 (!%p349_p6), 1, %v431_v27 }
   0xf   : > { %v408_v17 = vld [vmem:[%s1441_s2 + $0x18] sm:$0xff] (!%p349_p6)  ;;  %v842_v19 = vld [vmem:[%s1447_s8 + $0x10] sm:$0xff] (!%p349_p6)  ;;  %v882_v21 = vld [vmem:[%s1449_s10] sm:$0xff] (!%p349_p6)  ;;  %v561_v32 = vsub.s32 (!%p349_p6), 3, %v431_v27 }
  0x10   : > { %544 = vperm.xlu1 (!%p349_p6), %1161, %v489_v3   ;;  %1164 = vset.pattern.permute.xlu0 (!%p349_p6), %v1192_v4  ;;  %v451_v20 = vld [vmem:[%s1442_s3 + $0x18] sm:$0xff] (!%p349_p6)  ;;  %v841_v22 = vld [vmem:[%s1447_s8 + $0x8] sm:$0xff] (!%p349_p6) }
  0x11   : > { %494 = vperm.xlu0 (!%p349_p6), %1164, %v488_v1   ;;  %v843_v23 = vld [vmem:[%s1447_s8 + $0x18] sm:$0xff] (!%p349_p6)  ;;  %v883_v24 = vld [vmem:[%s1449_s10 + $0x8] sm:$0xff] (!%p349_p6) }
  0x12   : > { %s1456_s12 = smov (!%p392_p7, %s1079_s12), 3  ;;  %s1097_s17 = sshll.u32 (%p1279_p4), %s1267_s20, 4 }
  0x13   : > { %s1081_s13 = sshll.u32 %s1456_s12, 1  ;;  %s394_s23 = scalar_lea.vmem %s1439_s0, %s1456_s12 }
  0x14   : > { %1162 = vset.pattern.permute.xlu1 %v1192_v4  ;;  %s400_s16 = scalar_lea.vmem %s1440_s1, %s1081_s13 }
  0x15   : > { %499 = vperm.xlu0 %1164, %v489_v3   ;;  %509 = vperm.xlu1 %1162, %v491_v5   ;;  %v404_v34 = vld [vmem:[%s400_s16] sm:$0xf]  ;;  %s390_s16 = scalar_lea.vmem [#allocation2], %s1078_s15 }
  0x16   : > { %v516_v36 = vrot.slane %v404_v34, %v1358_v29  ;;  %v520_v37 = vrot.slane %v404_v34, %v519_v30  ;;  %v558_v38 = vrot.slane %v404_v34, %v1360_v31  ;;  %v562_v39 = vrot.slane %v404_v34, %v561_v32 }
  0x18   : > { %v526_v42 = vrot.slane %v516_v36, %v1358_v29  ;;  %v530_v43 = vrot.slane %v520_v37, %v1358_v29  ;;  %v568_v44 = vrot.slane %v558_v38, %v1360_v31  ;;  %v572_v45 = vrot.slane %v562_v39, %v1360_v31 }
  0x19   : > { %504 = vperm.xlu0 %1164, %v490_v0   ;;  %1165 = vset.pattern.permute.xlu1 %v1191_v2 }
  0x1a   : > { %552 = vperm.xlu1 %1165, %v491_v5  }
  0x1d   : > { %600 = vperm.xlu0 %1164, %v590_v6  }
  0x1e   : > { %1166 = vset.pattern.permute.xlu1 %v1192_v4 }
  0x1f   : > { %595 = vperm.xlu1 %1166, %v589_v7  }
  0x21   : > { %411 = vperm.xlu0 %1164, %v405_v8  }
  0x23   : > { %605 = vperm.xlu1 %1166, %v591_v9  }
  0x25   : > { %454 = vperm.xlu0 %1164, %v448_v10  }
  0x27   : > { %610 = vperm.xlu1 %1166, %v592_v11  }
  0x29   : > { %421 = vperm.xlu0 %1164, %v407_v12  }
  0x2b   : > { %416 = vperm.xlu1 %1166, %v406_v13  }
  0x2d   : > { %464 = vperm.xlu0 %1164, %v450_v14  }
  0x2f   : > { %459 = vperm.xlu1 %1166, %v449_v15  }
  0x31   : > { %846 = vperm.xlu0 %1164, %v840_v16  }
  0x33   : > { %426 = vperm.xlu1 %1166, %v408_v17  }
  0x35   : > { %856 = vperm.xlu0 %1164, %v842_v19  }
  0x37   : > { %469 = vperm.xlu1 %1166, %v451_v20  }
  0x39   : > { %886 = vperm.xlu0 %1164, %v882_v21   ;;  %v403_v21 = vld [vmem:[%s394_s23] sm:$0x3]  ;;  %s990_s23 = scalar_lea.vmem (%p1279_p4), %s1450_s11, %s1097_s17 }
  0x3a   : > { %v437_v30 = vrot.slane %v403_v21, %v1360_v31  ;;  %v633_v31 = vld [vmem:[%s1446_s7] sm:$0xff] }
  0x3b   : > { %851 = vperm.xlu1 %1166, %v841_v22  }
  0x3f   : > { %861 = vperm.xlu1 %1166, %v843_v23  }
  0x43   : > { %891 = vperm.xlu1 %1166, %v883_v24  }
  0x8b   : > { %v541_v26 = vpop.permute.xlu1 %540  ;;  %v549_v28 = vpop.permute.xlu0 %548 }
  0x8c   : > { %v573_v54 = vmul.f32 %v568_v44, %v541_v26  ;;  %v574_v55 = vmul.f32 %v572_v45, %v541_v26  ;;  %v577_v4 = vmul.f32 %v568_v44, %v549_v28  ;;  %v578_v5 = vmul.f32 %v572_v45, %v549_v28 }
  0x8d   : > { %v433_v28 = vrot.slane %v403_v21, %v1358_v29 }
  0x8f   : > { %v545_v33 = vpop.permute.xlu1 %544 }
  0x90   : > { %v495_v35 = vpop.permute.xlu0 %494  ;;  %v575_v49 = vmul.f32 %v568_v44, %v545_v33  ;;  %v576_v50 = vmul.f32 %v572_v45, %v545_v33 }
  0x91   : > { %v531_v51 = vmul.f32 %v526_v42, %v495_v35  ;;  %v532_v52 = vmul.f32 %v530_v43, %v495_v35 }
  0x93   : > { %v581_v61 = vadd.f32 %v573_v54, %v531_v51  ;;  %v582_v62 = vadd.f32 %v574_v55, %v532_v52 }
  0x94   : > { %v500_v40 = vpop.permute.xlu0 %499  ;;  %v510_v41 = vpop.permute.xlu1 %509 }
  0x95   : > { %v533_v46 = vmul.f32 %v526_v42, %v500_v40  ;;  %v534_v47 = vmul.f32 %v530_v43, %v500_v40  ;;  %v537_v13 = vmul.f32 %v526_v42, %v510_v41  ;;  %v538_v14 = vmul.f32 %v530_v43, %v510_v41 }
  0x97   : > { %v583_v56 = vadd.f32 %v575_v49, %v533_v46  ;;  %v584_v57 = vadd.f32 %v576_v50, %v534_v47 }
  0x98   : > { %v505_v48 = vpop.permute.xlu0 %504 }
  0x99   : > { %v553_v53 = vpop.permute.xlu1 %552  ;;  %v535_v0 = vmul.f32 %v526_v42, %v505_v48  ;;  %v536_v1 = vmul.f32 %v530_v43, %v505_v48 }
  0x9a   : > { %v579_v6 = vmul.f32 %v568_v44, %v553_v53  ;;  %v580_v7 = vmul.f32 %v572_v45, %v553_v53 }
  0x9b   : > { %v585_v16 = vadd.f32 %v577_v4, %v535_v0  ;;  %v586_v17 = vadd.f32 %v578_v5, %v536_v1 }
  0x9c   : > { %v601_v58 = vpop.permute.xlu0 %600  ;;  %v587_v25 = vadd.f32 %v579_v6, %v537_v13  ;;  %v588_v26 = vadd.f32 %v580_v7, %v538_v14  ;;  %v630_v13 = vld [vmem:[%s1445_s6 + $0x8] sm:$0xff]  ;;  %v631_v14 = vld [vmem:[%s1445_s6 + $0x10] sm:$0xff] }
  0x9d   : > { %v615_v59 = vadd.f32 %v601_v58, %v583_v56  ;;  %v616_v60 = vadd.f32 %v601_v58, %v584_v57  ;;  %v634_v57 = vld [vmem:[%s1446_s7 + $0x8] sm:$0xff] }
  0x9e   : > { %v596_v63 = vpop.permute.xlu1 %595 }
  0x9f   : > { %v613_v2 = vadd.f32 %v596_v63, %v581_v61  ;;  %v614_v3 = vadd.f32 %v596_v63, %v582_v62  ;;  %v623_v9 = vmax.f32 %v615_v59, 0.0  ;;  %v624_v12 = vmax.f32 %v616_v60, 0.0 }
  0xa0   : > { %v412_v8 = vpop.permute.xlu0 %411 }
  0xa1   : > { %v621_v10 = vmax.f32 %v613_v2, 0.0  ;;  %v622_v11 = vmax.f32 %v614_v3, 0.0  ;;  %v440_v39 = vmul.f32 %v433_v28, %v412_v8  ;;  %v441_v40 = vmul.f32 %v437_v30, %v412_v8  ;;  %v635_v2 = vld [vmem:[%s1446_s7 + $0x10] sm:$0xff] }
  0xa2   : > { %v606_v15 = vpop.permute.xlu1 %605 }
  0xa3   : > { %v1098_v19 = vpack.c.bf16 %v624_v12, %v622_v11  ;;  %v1100_v20 = vpack.c.bf16 %v623_v9, %v621_v10  ;;  %v617_v22 = vadd.f32 %v606_v15, %v585_v16  ;;  %v618_v23 = vadd.f32 %v606_v15, %v586_v17  ;;  %v636_v9 = vld [vmem:[%s1446_s7 + $0x18] sm:$0xff]  ;;  %v629_v12 = vld [vmem:[%s1445_s6] sm:$0xff] }
  0xa4   : > { %v455_v24 = vpop.permute.xlu0 %454  ;;  %v632_v15 = vld [vmem:[%s1445_s6 + $0x18] sm:$0xff] }
  0xa5   : > { %1099 = vmatprep.subr.bf16.mxu0 %v1098_v19  ;;  %v625_v34 = vmax.f32 %v617_v22, 0.0  ;;  %v626_v35 = vmax.f32 %v618_v23, 0.0  ;;  %v472_v44 = vadd.f32 %v455_v24, %v440_v39  ;;  %v473_v45 = vadd.f32 %v455_v24, %v441_v40 }
  0xa6   : > { %v611_v27 = vpop.permute.xlu1 %610  ;;  %1101 = vmatpush1.bf16.msra.mxu0 %v1100_v20 }
  0xa7   : > { %v619_v32 = vadd.f32 %v611_v27, %v587_v25  ;;  %v620_v33 = vadd.f32 %v611_v27, %v588_v26  ;;  %v480_v50 = vmax.f32 %v472_v44, 0.0  ;;  %v481_v51 = vmax.f32 %v473_v45, 0.0 }
  0xa8   : > { %v422_v41 = vpop.permute.xlu0 %421 }
  0xa9   : > { %v627_v36 = vmax.f32 %v619_v32, 0.0  ;;  %v628_v37 = vmax.f32 %v620_v33, 0.0  ;;  %v444_v55 = vmul.f32 %v433_v28, %v422_v41  ;;  %v445_v58 = vmul.f32 %v437_v30, %v422_v41 }
  0xaa   : > { %v417_v38 = vpop.permute.xlu1 %416 }
  0xab   : > { %v1102_v42 = vpack.c.bf16 %v628_v37, %v626_v35  ;;  %v1104_v43 = vpack.c.bf16 %v627_v36, %v625_v34  ;;  %v442_v46 = vmul.f32 %v433_v28, %v417_v38  ;;  %v443_v47 = vmul.f32 %v437_v30, %v417_v38 }
  0xac   : > { %v465_v52 = vpop.permute.xlu0 %464 }
  0xad   : > { %1103 = vmatprep.subr.bf16.mxu0 %v1102_v42  ;;  %v476_v61 = vadd.f32 %v465_v52, %v444_v55  ;;  %v477_v62 = vadd.f32 %v465_v52, %v445_v58 }
  0xae   : > { %v460_v29 = vpop.permute.xlu1 %459  ;;  %1105 = vmatpush1.bf16.msra.mxu0 %v1104_v43 }
  0xaf   : > { %v474_v48 = vadd.f32 %v460_v29, %v442_v46  ;;  %v475_v49 = vadd.f32 %v460_v29, %v443_v47  ;;  %v484_v5 = vmax.f32 %v476_v61, 0.0  ;;  %v485_v6 = vmax.f32 %v477_v62, 0.0  ;;  %v880_v61 = vld [vmem:[%s1448_s9] sm:$0xff]  ;;  %v881_v62 = vld [vmem:[%s1448_s9 + $0x8] sm:$0xff] }
  0xb0   : > { %v847_v23 = vpop.permute.xlu0 %846 }
  0xb1   : > { %v482_v53 = vmax.f32 %v474_v48, 0.0  ;;  %v483_v54 = vmax.f32 %v475_v49, 0.0  ;;  %1082 = vmatmul.mubr.msk.f32.vlgmr.msra.gmra.mrb[0].mxu0 %vm637_vm0, %v633_v31 }
  0xb2   : > { %v427_v56 = vpop.permute.xlu1 %426  ;;  %720 = vmatprep.mubr.f32.mxu0 %v1193_v18 }
  0xb3   : > { %v1108_v59 = vpack.c.bf16 %v482_v53, %v480_v50  ;;  %v1106_v60 = vpack.c.bf16 %v483_v54, %v481_v51  ;;  %v446_v63 = vmul.f32 %v433_v28, %v427_v56  ;;  %v447_v0 = vmul.f32 %v437_v30, %v427_v56 }
  0xb4   : > { %v857_v46 = vpop.permute.xlu0 %856 }
  0xb5   : > { %1083 = vmatmul.mubr.msk.f32.gmra.mrb[2].mxu0 %vm637_vm0, %v634_v57  ;;  %1107 = vmatprep.subr.bf16.mxu0 %v1106_v60 }
  0xb6   : > { %1122 = vmatprep.subr.bf16.mxu1 %v1106_v60  ;;  %v470_v1 = vpop.permute.xlu1 %469  ;;  %1109 = vmatpush1.bf16.msra.mxu0 %v1108_v59 }
  0xb7   : > { %v478_v3 = vadd.f32 %v470_v1, %v446_v63  ;;  %v479_v4 = vadd.f32 %v470_v1, %v447_v0  ;;  %1124 = vmatpush1.bf16.msra.mxu1 %v1108_v59  ;;  %726 = vmatprep.mubr.f32.mxu0 %v1193_v18 }
  0xb8   : > { %v887_v63 = vpop.permute.xlu0 %886 }
  0xb9   : > { %v486_v7 = vmax.f32 %v478_v3, 0.0  ;;  %v487_v8 = vmax.f32 %v479_v4, 0.0  ;;  %1084 = vmatmul.mubr.msk.f32.gmra.mrb[4].mxu0 %vm637_vm0, %v635_v2 }
  0xba   : > { %732 = vmatprep.mubr.f32.mxu0 %v1193_v18  ;;  %v852_v32 = vpop.permute.xlu1 %851 }
  0xbb   : > { %v1112_v10 = vpack.c.bf16 %v486_v7, %v484_v5  ;;  %v1110_v11 = vpack.c.bf16 %v487_v8, %v485_v6 }
  0xbd   : > { %1085 = vmatmul.mubr.msk.f32.gmra.mrb[6].mxu0 %vm637_vm0, %v636_v9  ;;  %1111 = vmatprep.subr.bf16.mxu0 %v1110_v11 }
  0xbe   : > { %1123 = vmatprep.subr.bf16.mxu1 %v1110_v11  ;;  %1113 = vmatpush1.bf16.msra.mxu0 %v1112_v10  ;;  %v862_v50 = vpop.permute.xlu1 %861 }
  0xbf   : > { %1125 = vmatpush1.bf16.msra.mxu1 %v1112_v10  ;;  %815 = vmatprep.mubr.f32.mxu0 %v1193_v18 }
  0xc1   : > { %1086 = vmatmul.mubr.msk.f32.vlgmr.msra.gmra.mrb[0].mxu0 %vm637_vm0, %v629_v12 }
  0xc2   : > { %1087 = vmatmul.mubr.msk.f32.vlgmr.msra.gmra.mrb[0].mxu1 %vm637_vm0, %v630_v13  ;;  %v892_v4 = vpop.permute.xlu1 %891 }
  0xc3   : > { %827 = vmatprep.mubr.f32.mxu1 %v1193_v18 }
  0xc6   : > { %1088 = vmatmul.mubr.msk.f32.gmra.mrb[2].mxu1 %vm637_vm0, %v631_v14 }
  0xc7   : > { %833 = vmatprep.mubr.f32.mxu1 %v1193_v18 }
  0xca   : > { %1089 = vmatmul.mubr.msk.f32.gmra.mrb[4].mxu1 %vm637_vm0, %v632_v15 }
  0xcb   : > { %964 = vmatprep.mubr.f32.mxu1 %v1193_v18 }
 0x188   : > { %v722_v16 = vpop.f32.mrb[2].mxu0 }
 0x189   : > { %v724_v17 = vpop.f32.mrb[3].mxu0 }
 0x18c   : > { %v728_v19 = vpop.f32.mrb[4].mxu0 }
 0x18d   : > { %v730_v20 = vpop.f32.mrb[5].mxu0 }
 0x190   : > { %v734_v21 = vpop.f32.mrb[6].mxu0 }
 0x191   : > { %v736_v22 = vpop.f32.mrb[7].mxu0 }
 0x194   : > { %v817_v24 = vpop.f32.mrb[0].mxu0 }
 0x195   : > { %v823_v25 = vpop.f32.mrb[0].mxu1  ;;  %v819_v26 = vpop.f32.mrb[1].mxu0  ;;  %v864_v27 = vadd.f32 %v847_v23, %v817_v24 }
 0x196   : > { %v824_v28 = vadd.f32 %v823_v25, %v722_v16  ;;  %v825_v30 = vpop.f32.mrb[1].mxu1  ;;  %v865_v33 = vadd.f32 %v847_v23, %v819_v26 }
 0x197   : > { %v826_v34 = vadd.f32 %v825_v30, %v724_v17  ;;  %v872_v38 = vmax.f32 %v864_v27, 0.0 }
 0x198   : > { %v866_v35 = vadd.f32 %v852_v32, %v824_v28  ;;  %v873_v42 = vmax.f32 %v865_v33, 0.0 }
 0x199   : > { %v867_v36 = vadd.f32 %v852_v32, %v826_v34  ;;  %v829_v37 = vpop.f32.mrb[2].mxu1 }
 0x19a   : > { %v874_v39 = vmax.f32 %v866_v35, 0.0  ;;  %v830_v40 = vadd.f32 %v829_v37, %v728_v19  ;;  %v831_v41 = vpop.f32.mrb[3].mxu1 }
 0x19b   : > { %v875_v43 = vmax.f32 %v867_v36, 0.0  ;;  %v832_v44 = vadd.f32 %v831_v41, %v730_v20 }
 0x19c   : > { %v1116_v45 = vpack.c.bf16 %v874_v39, %v872_v38  ;;  %v868_v31 = vadd.f32 %v857_v46, %v830_v40 }
 0x19d   : > { %v835_v47 = vpop.f32.mrb[4].mxu1  ;;  %v1114_v29 = vpack.c.bf16 %v875_v43, %v873_v42  ;;  %v869_v51 = vadd.f32 %v857_v46, %v832_v44 }
 0x19e   : > { %v836_v48 = vadd.f32 %v835_v47, %v734_v21  ;;  %v837_v49 = vpop.f32.mrb[5].mxu1  ;;  %v876_v55 = vmax.f32 %v868_v31, 0.0 }
 0x19f   : > { %v838_v52 = vadd.f32 %v837_v49, %v736_v22  ;;  %1115 = vmatprep.subr.bf16.mxu1 %v1114_v29  ;;  %v877_v57 = vmax.f32 %v869_v51, 0.0 }
 0x1a0   : > { %v870_v53 = vadd.f32 %v862_v50, %v836_v48  ;;  %1117 = vmatpush1.bf16.msra.mxu1 %v1116_v45 }
 0x1a1   : > { %v871_v54 = vadd.f32 %v862_v50, %v838_v52 }
 0x1a2   : > { %v878_v56 = vmax.f32 %v870_v53, 0.0 }
 0x1a3   : > { %v879_v58 = vmax.f32 %v871_v54, 0.0 }
 0x1a4   : > { %v1120_v59 = vpack.c.bf16 %v878_v56, %v876_v55 }
 0x1a5   : > { %v1118_v60 = vpack.c.bf16 %v879_v58, %v877_v57 }
 0x1a7   : > { %1119 = vmatprep.subr.bf16.mxu1 %v1118_v60 }
 0x1a8   : > { %1121 = vmatpush1.bf16.msra.mxu1 %v1120_v59 }
 0x1ab   : > { %1090 = vmatmul.mubr.msk.f32.vlgmr.msra.gmra.mrb[6].mxu1 %vm637_vm0, %v880_v61 }
 0x1ac   : > { %970 = vmatprep.mubr.f32.mxu1 %v1193_v18 }
 0x1af   : > { %1091 = vmatmul.mubr.msk.f32.gmra.mrb[8].mxu1 %vm637_vm0, %v881_v62 }
 0x27e   : > { %v966_v0 = vpop.f32.mrb[6].mxu1 }
 0x27f   : > { %v967_v1 = vadd.f32 %v966_v0, %v887_v63  ;;  %v968_v2 = vpop.f32.mrb[7].mxu1 }
 0x280   : > { %v969_v3 = vadd.f32 %v968_v2, %v887_v63  ;;  %987 = sbr.rel (!%p1279_p4) target bundleno = 655 (0x28f), region = 68 }
 0x281   : > { %977 = vst [vmem:[%s390_s16] sm:$0xff] %v967_v1 }
 0x282   : > { %978 = vst [vmem:[%s390_s16 + $0x8] sm:$0xff] %v969_v3  ;;  %v972_v5 = vpop.f32.mrb[8].mxu1 }
 0x283   : > { %v973_v6 = vadd.f32 %v972_v5, %v892_v4  ;;  %v974_v18 = vpop.f32.mrb[9].mxu1 }
 0x284   : > { %v975_v7 = vadd.f32 %v974_v18, %v892_v4 }
 0x285   : > { %979 = vst [vmem:[%s390_s16 + $0x10] sm:$0xff] %v973_v6 }
 0x286   : > { %980 = vst [vmem:[%s390_s16 + $0x18] sm:$0xff] %v975_v7 }
 0x288   : > { %v1003_v8 = vld [vmem:[%s390_s16] sm:$0xff] }
 0x289   : > { %v1005_v9 = vld [vmem:[%s390_s16 + $0x8] sm:$0xff]  ;;  %1004 = vst [vmem:[%s990_s23] sm:$0xff] %v1003_v8 }
 0x28a   : > { %1006 = vst [vmem:[%s990_s23 + $0x8] sm:$0xff] %v1005_v9 }
 0x28c   : > { %v1007_v10 = vld [vmem:[%s390_s16 + $0x10] sm:$0xff] }
 0x28d   : > { %v1009_v11 = vld [vmem:[%s390_s16 + $0x18] sm:$0xff]  ;;  %1008 = vst [vmem:[%s990_s23 + $0x20] sm:$0xff] %v1007_v10 }
 0x28e   : > { %1010 = vst [vmem:[%s990_s23 + $0x28] sm:$0xff] %v1009_v11 }
 0x28f PF: > { %p18_p8 = scmp.ge.s32.totalorder %s1269_s21, 4   ;;  %s1452_s17 = smov %s1185_s18 }
 0x290   : > { %s1453_s18 = smov %s1277_s24  ;;  %s1454_s19 = smov %s1269_s21 }
 0x291   :  { %20 = sbr.rel (!%p18_p8) target bundleno = 2 (0x2), region = 120 }

</bundles_post_ra>
